<compile_context>
chip_gen: v5e
topology: v5e:2x2
jax: 0.10.0
libtpu: 0.0.40
codegen_flags: <defaults>
</compile_context>

<pallas_src>
import functools

import jax
import jax.numpy as jnp
from jax.experimental import pallas as pl
from jax.experimental.pallas import tpu as pltpu

BN_EPS = 1e-5


def _evolver_kernel(
    field_ref,                 # [N, D]  f32 (N = B*M)
    w1_ref, w2_ref, w3_ref,    # fused conv weights, bf16
    bconst_ref,                # [1, D]  f32  (= conv3_b + residual_b)
    g1_ref, be1_ref,           # [1, H]  f32  (bn1 gamma/beta)
    g2_ref, be2_ref,           # [1, H]  f32  (bn2 gamma/beta)
    out_ref,                   # [N, D]
    *, time_steps, m_points,
):
    n_rows = field_ref.shape[0]
    inv_n = 1.0 / n_rows

    f = field_ref[...].astype(jnp.float32)

    # Weights / affine params loaded once (values, reused every step).
    w1 = w1_ref[...]          # [3D, H+D] bf16   (conv1 taps | residual Wr^T)
    w2 = w2_ref[...]          # [3H, H]   bf16
    w3 = w3_ref[...]          # [3H, D]   bf16
    bconst = bconst_ref[...]  # [1, D]
    g1, be1 = g1_ref[...], be1_ref[...]
    g2, be2 = g2_ref[...], be2_ref[...]
    hidden = w2.shape[1]      # NOTE: keep a multiple of 128 (H=128 default) so the
    d = f.shape[1]            # out1 column split / lane concats stay relayout-free.

    # --- boundary masks: full-width, hoisted out of the time loop (built once) ---
    pos = jax.lax.broadcasted_iota(jnp.int32, (n_rows, 1), 0)
    m_idx = pos % m_points
    not_first = (m_idx != 0).astype(jnp.float32)            # [N, 1]
    not_last = (m_idx != (m_points - 1)).astype(jnp.float32)
    ones_d = jnp.ones((1, d), jnp.float32)
    ones_h = jnp.ones((1, hidden), jnp.float32)
    mask_prev_d = not_first * ones_d                          # [N, D]
    mask_next_d = not_last * ones_d                           # [N, D]
    mask_prev_h = not_first * ones_h                          # [N, H]
    mask_next_h = not_last * ones_h                           # [N, H]

    def shifted_cat(x, m_prev, m_next):
        # Shifts are along the flattened B*M axis (XLU sublane rotate); the 0/1
        # masks zero the rows that would otherwise leak across batch boundaries,
        # reproducing the per-batch zero padding of Conv1d(padding=1).
        # Roll/mask in f32, cast each piece to bf16 BEFORE the lane concat.
        x_prev = (pltpu.roll(x, 1, axis=0) * m_prev).astype(jnp.bfloat16)
        x_next = (pltpu.roll(x, n_rows - 1, axis=0) * m_next).astype(jnp.bfloat16)
        return jnp.concatenate([x_prev, x.astype(jnp.bfloat16), x_next], axis=-1)

    def bn_relu(y, gamma, beta):
        # Two-pass (centered) batch statistics: numerically safe versus the
        # E[y^2]-E[y]^2 single-pass form.  The affine is folded into one FMA:
        #   relu(yc * (gamma * rsqrt(var+eps)) + beta)   -- scale is [1,H] math.
        mean = jnp.sum(y, axis=0, keepdims=True) * inv_n
        yc = y - mean
        var = jnp.sum(yc * yc, axis=0, keepdims=True) * inv_n
        scale = gamma * jax.lax.rsqrt(var + BN_EPS)
        return jnp.maximum(yc * scale + beta, 0.0)

    def step(f):
        # conv1 (3 taps fused into one K=3D matmul) with the residual Linear
        # folded in as extra output columns; bf16 operands, f32 accumulation.
        lhs1 = shifted_cat(f, mask_prev_d, mask_next_d)
        out1 = jnp.dot(lhs1, w1, preferred_element_type=jnp.float32)   # [N, H+D]
        h = bn_relu(out1[:, :hidden], g1, be1)      # conv1 bias cancels under BN
        res = out1[:, hidden:]                      # residual branch (of original f)

        lhs2 = shifted_cat(h, mask_prev_h, mask_next_h)
        h = bn_relu(jnp.dot(lhs2, w2, preferred_element_type=jnp.float32),
                    g2, be2)                         # conv2 bias cancels under BN

        lhs3 = shifted_cat(h, mask_prev_h, mask_next_h)
        x = jnp.dot(lhs3, w3, preferred_element_type=jnp.float32)

        # b3 + br merged into a single constant add.
        return f + res + x + bconst

    if time_steps <= 8:
        # Full unroll: each step is tiny, so let the LLO scheduler overlap
        # step-t's VALU tail with step-(t+1)'s XLU rolls / MXU fill.
        for _ in range(time_steps):
            f = step(f)
    else:
        f = jax.lax.fori_loop(0, time_steps, lambda _, ff: step(ff), f, unroll=2)

    # TODO(synk): lane-dense [B, M*D] output store skipped — only worth it if
    # N scales up; at these shapes the output is a single tiny store.
    out_ref[...] = f.astype(out_ref.dtype)


def _prepare_params(params):
    """Re-arrange torch-layout parameters into the kernel's fused operands."""
    D = params["conv1_w"].shape[1]

    def taps(w):
        # Conv1d weight [Cout, Cin, 3] -> [3*Cin, Cout]; tap 0 hits x[m-1],
        # tap 1 hits x[m], tap 2 hits x[m+1] (padding=1 convention).
        return jnp.transpose(w, (2, 1, 0)).reshape(3 * w.shape[1], w.shape[0])

    # Fuse conv1 taps and fold the residual Linear in as extra output columns.
    w1_block = taps(params["conv1_w"])                               # [3D, H]
    zeros_dd = jnp.zeros((D, D), jnp.float32)
    w1_res = jnp.concatenate(
        [zeros_dd, params["residual_w"].T, zeros_dd], axis=0)        # [3D, D]
    w1 = jnp.concatenate([w1_block, w1_res], axis=1).astype(jnp.bfloat16)
    w2 = taps(params["conv2_w"]).astype(jnp.bfloat16)                # [3H, H]
    w3 = taps(params["conv3_w"]).astype(jnp.bfloat16)                # [3H, D]

    row = lambda v: v.reshape(1, -1).astype(jnp.float32)
    # conv1_b / conv2_b are intentionally dropped: training-mode BatchNorm's
    # per-channel mean subtraction cancels them exactly.
    bconst = row(params["conv3_b"] + params["residual_b"])           # [1, D]
    return (w1, w2, w3, bconst,
            row(params["bn1_g"]), row(params["bn1_b"]),
            row(params["bn2_g"]), row(params["bn2_b"]))


@functools.partial(jax.jit, static_argnames=("time_steps",))
def field_evolver_forward(field, grid_points, params, time_steps=1):
    """field: [B, M, D]; grid_points: [B, M, P] (unused by the CNN evolver)."""
    del grid_points  # CNN evolver ignores the spatial grid.

    B, M, D = field.shape
    H = params["conv1_w"].shape[0]
    N = B * M

    prepared = _prepare_params(params)
    args = (field.reshape(N, D).astype(jnp.float32),) + prepared

    flops = 2 * N * (3 * D * (H + D) + 3 * H * H + 3 * H * D) * time_steps
    bytes_accessed = (
        2 * N * D * 4
        + sum(int(w.size) for w in prepared[:3]) * 2
        + (D + 4 * H) * 4
    )

    vmem = pl.BlockSpec(memory_space=pltpu.MemorySpace.VMEM)
    # TODO(synk): no grid / megacore sharding — training-mode BN statistics span
    # the full (B, M) extent; scaling N (or using the 2nd TC on v7x) needs a
    # two-pass cross-tile (sum, sumsq) reduction which is not worth it at N=32.
    out2d = pl.pallas_call(
        functools.partial(_evolver_kernel, time_steps=int(time_steps), m_points=M),
        out_shape=jax.ShapeDtypeStruct((N, D), jnp.float32),
        in_specs=[vmem] * len(args),
        out_specs=vmem,
        input_output_aliases={0: 0},   # field-in and (N,D)-out share the HBM buffer
        cost_estimate=pl.CostEstimate(
            flops=flops, transcendentals=0, bytes_accessed=bytes_accessed),
    )(*args)
    return out2d.reshape(B, M, D).astype(field.dtype)


def _reference_forward(field, params, time_steps):
    """Pure-JAX reference mirroring the kernel math (jnp.roll instead of pltpu.roll)."""
    B, M, D = field.shape
    H = params["conv1_w"].shape[0]
    N = B * M
    w1, w2, w3, bconst, g1, be1, g2, be2 = _prepare_params(params)

    f = field.reshape(N, D).astype(jnp.float32)
    m_idx = (jnp.arange(N) % M)[:, None]
    not_first = (m_idx != 0).astype(jnp.float32)
    not_last = (m_idx != (M - 1)).astype(jnp.float32)

    def shifted_cat(x):
        x_prev = (jnp.roll(x, 1, axis=0) * not_first).astype(jnp.bfloat16)
        x_next = (jnp.roll(x, -1, axis=0) * not_last).astype(jnp.bfloat16)
        return jnp.concatenate([x_prev, x.astype(jnp.bfloat16), x_next], axis=-1)

    def bn_relu(y, g, b):
        mean = jnp.mean(y, axis=0, keepdims=True)
        yc = y - mean
        var = jnp.mean(yc * yc, axis=0, keepdims=True)
        return jnp.maximum(yc * (g * jax.lax.rsqrt(var + BN_EPS)) + b, 0.0)

    for _ in range(time_steps):
        out1 = jnp.dot(shifted_cat(f), w1, preferred_element_type=jnp.float32)
        h = bn_relu(out1[:, :H], g1, be1)
        res = out1[:, H:]
        h = bn_relu(jnp.dot(shifted_cat(h), w2, preferred_element_type=jnp.float32),
                    g2, be2)
        x = jnp.dot(shifted_cat(h), w3, preferred_element_type=jnp.float32)
        f = f + res + x + bconst
    return f.reshape(B, M, D)


def _assert_close(out, ref):
    err = float(jnp.max(jnp.abs(out - ref)))
    scale = float(jnp.max(jnp.abs(ref)))
    assert err <= 1e-3 * max(scale, 1.0), (err, scale)


def init_params(key, embed_dim, hidden_dim):
    ks = jax.random.split(key, 8)
    s = lambda fan_in: 1.0 / jnp.sqrt(fan_in)
    return {
        "conv1_w": jax.random.normal(ks[0], (hidden_dim, embed_dim, 3), jnp.float32) * s(3 * embed_dim),
        "conv1_b": jax.random.normal(ks[1], (hidden_dim,), jnp.float32) * 0.01,
        "conv2_w": jax.random.normal(ks[2], (hidden_dim, hidden_dim, 3), jnp.float32) * s(3 * hidden_dim),
        "conv2_b": jax.random.normal(ks[3], (hidden_dim,), jnp.float32) * 0.01,
        "conv3_w": jax.random.normal(ks[4], (embed_dim, hidden_dim, 3), jnp.float32) * s(3 * hidden_dim),
        "conv3_b": jax.random.normal(ks[5], (embed_dim,), jnp.float32) * 0.01,
        "bn1_g": jnp.ones((hidden_dim,), jnp.float32),
        "bn1_b": jnp.zeros((hidden_dim,), jnp.float32),
        "bn2_g": jnp.ones((hidden_dim,), jnp.float32),
        "bn2_b": jnp.zeros((hidden_dim,), jnp.float32),
        "residual_w": jax.random.normal(ks[6], (embed_dim, embed_dim), jnp.float32) * s(embed_dim),
        "residual_b": jax.random.normal(ks[7], (embed_dim,), jnp.float32) * 0.01,
    }


if __name__ == "__main__":
    B, M, D, P, H = 2, 16, 32, 3, 128  # hidden_dim=128 is the CNNFieldEvolver default
    key = jax.random.PRNGKey(0)
    k_field, k_grid, k_params = jax.random.split(key, 3)

    field = jax.random.normal(k_field, (B, M, D), jnp.float32)
    grid_points = jax.random.normal(k_grid, (B, M, P), jnp.float32)
    params = init_params(k_params, D, H)

    # time_steps=1 (unrolled path)
    out1 = jax.block_until_ready(
        field_evolver_forward(field, grid_points, params, time_steps=1))
    assert out1.shape == (B, M, D) and out1.dtype == jnp.float32
    _assert_close(out1, _reference_forward(field, params, 1))

    # time_steps=4 (still fully unrolled)
    out4 = jax.block_until_ready(
        field_evolver_forward(field, grid_points, params, time_steps=4))
    _assert_close(out4, _reference_forward(field, params, 4))

    # time_steps=10 exercises the fori_loop(unroll=2) path for long rollouts.
    out10 = jax.block_until_ready(
        field_evolver_forward(field, grid_points, params, time_steps=10))
    _assert_close(out10, _reference_forward(field, params, 10))

    print("KERNEL_OK")
</pallas_src>

<mosaic_0001>
module attributes {stable_mosaic.version = 11 : i64} {
  func.func @_evolver_kernel(%arg0: memref<32x32xf32, #tpu.memory_space<vmem>>, %arg1: memref<96x160xbf16, #tpu.memory_space<vmem>>, %arg2: memref<384x128xbf16, #tpu.memory_space<vmem>>, %arg3: memref<384x32xbf16, #tpu.memory_space<vmem>>, %arg4: memref<1x32xf32, #tpu.memory_space<vmem>>, %arg5: memref<1x128xf32, #tpu.memory_space<vmem>>, %arg6: memref<1x128xf32, #tpu.memory_space<vmem>>, %arg7: memref<1x128xf32, #tpu.memory_space<vmem>>, %arg8: memref<1x128xf32, #tpu.memory_space<vmem>>, %arg9: memref<32x32xf32, #tpu.memory_space<vmem>>) attributes {dimension_semantics = [], scalar_prefetch = 0 : i64, scratch_operands = 0 : i64, tpu.core_type = #tpu.core_type<tc>} {
    %c0 = arith.constant 0 : index
    %c0_0 = arith.constant 0 : index
    %0 = vector.load %arg0[%c0, %c0_0] : memref<32x32xf32, #tpu.memory_space<vmem>>, vector<32x32xf32>
    %c0_1 = arith.constant 0 : index
    %c0_2 = arith.constant 0 : index
    %1 = vector.load %arg1[%c0_1, %c0_2] : memref<96x160xbf16, #tpu.memory_space<vmem>>, vector<96x160xbf16>
    %c0_3 = arith.constant 0 : index
    %c0_4 = arith.constant 0 : index
    %2 = vector.load %arg2[%c0_3, %c0_4] : memref<384x128xbf16, #tpu.memory_space<vmem>>, vector<384x128xbf16>
    %c0_5 = arith.constant 0 : index
    %c0_6 = arith.constant 0 : index
    %3 = vector.load %arg3[%c0_5, %c0_6] : memref<384x32xbf16, #tpu.memory_space<vmem>>, vector<384x32xbf16>
    %c0_7 = arith.constant 0 : index
    %c0_8 = arith.constant 0 : index
    %4 = vector.load %arg4[%c0_7, %c0_8] : memref<1x32xf32, #tpu.memory_space<vmem>>, vector<1x32xf32>
    %c0_9 = arith.constant 0 : index
    %c0_10 = arith.constant 0 : index
    %5 = vector.load %arg5[%c0_9, %c0_10] : memref<1x128xf32, #tpu.memory_space<vmem>>, vector<1x128xf32>
    %c0_11 = arith.constant 0 : index
    %c0_12 = arith.constant 0 : index
    %6 = vector.load %arg6[%c0_11, %c0_12] : memref<1x128xf32, #tpu.memory_space<vmem>>, vector<1x128xf32>
    %c0_13 = arith.constant 0 : index
    %c0_14 = arith.constant 0 : index
    %7 = vector.load %arg7[%c0_13, %c0_14] : memref<1x128xf32, #tpu.memory_space<vmem>>, vector<1x128xf32>
    %c0_15 = arith.constant 0 : index
    %c0_16 = arith.constant 0 : index
    %8 = vector.load %arg8[%c0_15, %c0_16] : memref<1x128xf32, #tpu.memory_space<vmem>>, vector<1x128xf32>
    %9 = tpu.iota {dimensions = array<i32: 0>} : vector<32x1xi32>
    %c16_i32 = arith.constant 16 : i32
    %c0_i32 = arith.constant 0 : i32
    %10 = arith.cmpi eq, %c16_i32, %c0_i32 : i32
    %c1_i32 = arith.constant 1 : i32
    %11 = arith.select %10, %c1_i32, %c16_i32 : i32
    %12 = vector.broadcast %11 : i32 to vector<32x1xi32>
    %13 = arith.remsi %9, %12 : vector<32x1xi32>
    %c0_i32_17 = arith.constant 0 : i32
    %14 = vector.broadcast %c0_i32_17 : i32 to vector<32x1xi32>
    %15 = arith.cmpi ne, %13, %14 : vector<32x1xi32>
    %c0_i32_18 = arith.constant 0 : i32
    %16 = vector.broadcast %c0_i32_18 : i32 to vector<32x1xi32>
    %17 = arith.cmpi slt, %13, %16 : vector<32x1xi32>
    %c0_i32_19 = arith.constant 0 : i32
    %18 = arith.cmpi slt, %11, %c0_i32_19 : i32
    %19 = vector.broadcast %18 : i1 to vector<32x1xi1>
    %20 = vector.broadcast %19 : vector<32x1xi1> to vector<32x1xi1>
    %21 = arith.xori %17, %20 : vector<32x1xi1>
    %22 = arith.andi %21, %15 : vector<32x1xi1>
    %23 = vector.broadcast %11 : i32 to vector<32x1xi32>
    %24 = arith.addi %13, %23 : vector<32x1xi32>
    %25 = arith.select %22, %24, %13 : vector<32x1xi1>, vector<32x1xi32>
    %c0_i32_20 = arith.constant 0 : i32
    %26 = vector.broadcast %c0_i32_20 : i32 to vector<32x1xi32>
    %27 = arith.cmpi ne, %25, %26 : vector<32x1xi32>
    %28 = arith.extui %27 : vector<32x1xi1> to vector<32x1xi32>
    %29 = arith.sitofp %28 : vector<32x1xi32> to vector<32x1xf32>
    %c15_i32 = arith.constant 15 : i32
    %30 = vector.broadcast %c15_i32 : i32 to vector<32x1xi32>
    %31 = arith.cmpi ne, %25, %30 : vector<32x1xi32>
    %32 = arith.extui %31 : vector<32x1xi1> to vector<32x1xi32>
    %33 = arith.sitofp %32 : vector<32x1xi32> to vector<32x1xf32>
    %cst = arith.constant 1.000000e+00 : f32
    %34 = vector.broadcast %cst : f32 to vector<1x32xf32>
    %cst_21 = arith.constant 1.000000e+00 : f32
    %35 = vector.broadcast %cst_21 : f32 to vector<1x128xf32>
    %36 = vector.broadcast %29 : vector<32x1xf32> to vector<32x32xf32>
    %37 = vector.broadcast %34 : vector<1x32xf32> to vector<32x32xf32>
    %38 = arith.mulf %36, %37 : vector<32x32xf32>
    %39 = vector.broadcast %33 : vector<32x1xf32> to vector<32x32xf32>
    %40 = vector.broadcast %34 : vector<1x32xf32> to vector<32x32xf32>
    %41 = arith.mulf %39, %40 : vector<32x32xf32>
    %42 = vector.broadcast %29 : vector<32x1xf32> to vector<32x128xf32>
    %43 = vector.broadcast %35 : vector<1x128xf32> to vector<32x128xf32>
    %44 = arith.mulf %42, %43 : vector<32x128xf32>
    %45 = vector.broadcast %33 : vector<32x1xf32> to vector<32x128xf32>
    %46 = vector.broadcast %35 : vector<1x128xf32> to vector<32x128xf32>
    %47 = arith.mulf %45, %46 : vector<32x128xf32>
    %c1_i32_22 = arith.constant 1 : i32
    %48 = tpu.dynamic_rotate %0 by %c1_i32_22 dim 0 : vector<32x32xf32>, i32 -> vector<32x32xf32>
    %49 = arith.mulf %48, %38 : vector<32x32xf32>
    %50 = arith.truncf %49 : vector<32x32xf32> to vector<32x32xbf16>
    %c31_i32 = arith.constant 31 : i32
    %51 = tpu.dynamic_rotate %0 by %c31_i32 dim 0 : vector<32x32xf32>, i32 -> vector<32x32xf32>
    %52 = arith.mulf %51, %41 : vector<32x32xf32>
    %53 = arith.truncf %52 : vector<32x32xf32> to vector<32x32xbf16>
    %54 = arith.truncf %0 : vector<32x32xf32> to vector<32x32xbf16>
    %55 = tpu.concatenate %50, %54, %53 in 1 : vector<32x32xbf16>, vector<32x32xbf16>, vector<32x32xbf16> -> vector<32x96xbf16>
    %cst_23 = arith.constant dense<0.000000e+00> : vector<32x160xf32>
    %56 = tpu.matmul %55, %1, %cst_23 {dimension_numbers = #tpu.dot_dimension_numbers<[1], [0], [0], [1], [0, 0, 1, 1], [], []>} : vector<32x96xbf16>, vector<96x160xbf16>, vector<32x160xf32> -> vector<32x160xf32>
    %57 = vector.extract_strided_slice %56 {offsets = [0, 0], sizes = [32, 128], strides = [1, 1]} : vector<32x160xf32> to vector<32x128xf32>
    %cst_24 = arith.constant dense<0.000000e+00> : vector<128xf32>
    %58 = vector.multi_reduction <add>, %57, %cst_24 [0] : vector<32x128xf32> to vector<128xf32>
    %59 = vector.shape_cast %58 : vector<128xf32> to vector<1x128xf32>
    %cst_25 = arith.constant 3.125000e-02 : f32
    %60 = vector.broadcast %cst_25 : f32 to vector<1x128xf32>
    %61 = arith.mulf %59, %60 : vector<1x128xf32>
    %62 = vector.broadcast %61 : vector<1x128xf32> to vector<32x128xf32>
    %63 = arith.subf %57, %62 : vector<32x128xf32>
    %64 = arith.mulf %63, %63 : vector<32x128xf32>
    %cst_26 = arith.constant dense<0.000000e+00> : vector<128xf32>
    %65 = vector.multi_reduction <add>, %64, %cst_26 [0] : vector<32x128xf32> to vector<128xf32>
    %66 = vector.shape_cast %65 : vector<128xf32> to vector<1x128xf32>
    %cst_27 = arith.constant 3.125000e-02 : f32
    %67 = vector.broadcast %cst_27 : f32 to vector<1x128xf32>
    %68 = arith.mulf %66, %67 : vector<1x128xf32>
    %cst_28 = arith.constant 9.99999974E-6 : f32
    %69 = vector.broadcast %cst_28 : f32 to vector<1x128xf32>
    %70 = arith.addf %68, %69 : vector<1x128xf32>
    %71 = math.rsqrt %70 : vector<1x128xf32>
    %72 = arith.mulf %5, %71 : vector<1x128xf32>
    %73 = vector.broadcast %72 : vector<1x128xf32> to vector<32x128xf32>
    %74 = arith.mulf %63, %73 : vector<32x128xf32>
    %75 = vector.broadcast %6 : vector<1x128xf32> to vector<32x128xf32>
    %76 = arith.addf %74, %75 : vector<32x128xf32>
    %cst_29 = arith.constant 0.000000e+00 : f32
    %77 = vector.broadcast %cst_29 : f32 to vector<32x128xf32>
    %78 = arith.maximumf %76, %77 : vector<32x128xf32>
    %79 = vector.extract_strided_slice %56 {offsets = [0, 128], sizes = [32, 32], strides = [1, 1]} : vector<32x160xf32> to vector<32x32xf32>
    %c1_i32_30 = arith.constant 1 : i32
    %80 = tpu.dynamic_rotate %78 by %c1_i32_30 dim 0 : vector<32x128xf32>, i32 -> vector<32x128xf32>
    %81 = arith.mulf %80, %44 : vector<32x128xf32>
    %82 = arith.truncf %81 : vector<32x128xf32> to vector<32x128xbf16>
    %c31_i32_31 = arith.constant 31 : i32
    %83 = tpu.dynamic_rotate %78 by %c31_i32_31 dim 0 : vector<32x128xf32>, i32 -> vector<32x128xf32>
    %84 = arith.mulf %83, %47 : vector<32x128xf32>
    %85 = arith.truncf %84 : vector<32x128xf32> to vector<32x128xbf16>
    %86 = arith.truncf %78 : vector<32x128xf32> to vector<32x128xbf16>
    %87 = tpu.concatenate %82, %86, %85 in 1 : vector<32x128xbf16>, vector<32x128xbf16>, vector<32x128xbf16> -> vector<32x384xbf16>
    %cst_32 = arith.constant dense<0.000000e+00> : vector<32x128xf32>
    %88 = tpu.matmul %87, %2, %cst_32 {dimension_numbers = #tpu.dot_dimension_numbers<[1], [0], [0], [1], [0, 0, 1, 1], [], []>} : vector<32x384xbf16>, vector<384x128xbf16>, vector<32x128xf32> -> vector<32x128xf32>
    %cst_33 = arith.constant dense<0.000000e+00> : vector<128xf32>
    %89 = vector.multi_reduction <add>, %88, %cst_33 [0] : vector<32x128xf32> to vector<128xf32>
    %90 = vector.shape_cast %89 : vector<128xf32> to vector<1x128xf32>
    %cst_34 = arith.constant 3.125000e-02 : f32
    %91 = vector.broadcast %cst_34 : f32 to vector<1x128xf32>
    %92 = arith.mulf %90, %91 : vector<1x128xf32>
    %93 = vector.broadcast %92 : vector<1x128xf32> to vector<32x128xf32>
    %94 = arith.subf %88, %93 : vector<32x128xf32>
    %95 = arith.mulf %94, %94 : vector<32x128xf32>
    %cst_35 = arith.constant dense<0.000000e+00> : vector<128xf32>
    %96 = vector.multi_reduction <add>, %95, %cst_35 [0] : vector<32x128xf32> to vector<128xf32>
    %97 = vector.shape_cast %96 : vector<128xf32> to vector<1x128xf32>
    %cst_36 = arith.constant 3.125000e-02 : f32
    %98 = vector.broadcast %cst_36 : f32 to vector<1x128xf32>
    %99 = arith.mulf %97, %98 : vector<1x128xf32>
    %cst_37 = arith.constant 9.99999974E-6 : f32
    %100 = vector.broadcast %cst_37 : f32 to vector<1x128xf32>
    %101 = arith.addf %99, %100 : vector<1x128xf32>
    %102 = math.rsqrt %101 : vector<1x128xf32>
    %103 = arith.mulf %7, %102 : vector<1x128xf32>
    %104 = vector.broadcast %103 : vector<1x128xf32> to vector<32x128xf32>
    %105 = arith.mulf %94, %104 : vector<32x128xf32>
    %106 = vector.broadcast %8 : vector<1x128xf32> to vector<32x128xf32>
    %107 = arith.addf %105, %106 : vector<32x128xf32>
    %cst_38 = arith.constant 0.000000e+00 : f32
    %108 = vector.broadcast %cst_38 : f32 to vector<32x128xf32>
    %109 = arith.maximumf %107, %108 : vector<32x128xf32>
    %c1_i32_39 = arith.constant 1 : i32
    %110 = tpu.dynamic_rotate %109 by %c1_i32_39 dim 0 : vector<32x128xf32>, i32 -> vector<32x128xf32>
    %111 = arith.mulf %110, %44 : vector<32x128xf32>
    %112 = arith.truncf %111 : vector<32x128xf32> to vector<32x128xbf16>
    %c31_i32_40 = arith.constant 31 : i32
    %113 = tpu.dynamic_rotate %109 by %c31_i32_40 dim 0 : vector<32x128xf32>, i32 -> vector<32x128xf32>
    %114 = arith.mulf %113, %47 : vector<32x128xf32>
    %115 = arith.truncf %114 : vector<32x128xf32> to vector<32x128xbf16>
    %116 = arith.truncf %109 : vector<32x128xf32> to vector<32x128xbf16>
    %117 = tpu.concatenate %112, %116, %115 in 1 : vector<32x128xbf16>, vector<32x128xbf16>, vector<32x128xbf16> -> vector<32x384xbf16>
    %cst_41 = arith.constant dense<0.000000e+00> : vector<32x32xf32>
    %118 = tpu.matmul %117, %3, %cst_41 {dimension_numbers = #tpu.dot_dimension_numbers<[1], [0], [0], [1], [0, 0, 1, 1], [], []>} : vector<32x384xbf16>, vector<384x32xbf16>, vector<32x32xf32> -> vector<32x32xf32>
    %119 = arith.addf %0, %79 : vector<32x32xf32>
    %120 = arith.addf %119, %118 : vector<32x32xf32>
    %121 = vector.broadcast %4 : vector<1x32xf32> to vector<32x32xf32>
    %122 = arith.addf %120, %121 : vector<32x32xf32>
    %c0_42 = arith.constant 0 : index
    %c0_43 = arith.constant 0 : index
    %123 = vector.load %arg9[%c0_42, %c0_43] : memref<32x32xf32, #tpu.memory_space<vmem>>, vector<32x32xf32>
    tpu.vector_store %arg9[%c0_42, %c0_43], %122 {strides = array<i32>} : memref<32x32xf32, #tpu.memory_space<vmem>>, vector<32x32xf32>,
    return
  }
}

</mosaic_0001>

<bundles_post_ra>
// kernel: field_evolver_forward.1
= control target key start
LH: loop header
LB: loop body
LE: loop exit
PB: predicated region body
PF: predicated region fallthrough
CT: control target
= control target key end

     0   :  { %v150_v0 = vlaneseq  ;;  %s1424_s12 = smov 32   ;;  %v1425_v37 = vmov 0.0   ;;  %s1426_s29 = smov 64   ;;  %vm303_vm6 = vcmask 261120   ;;  %vm310_vm7 = vcmask 523264   ;;  %s1898_s0 = inlined_call_operand.vmem [shape: f32[32,32], index: 0, kind: input, shape index: {}, may-alias: {0,9}]   ;;  %s1899_s1 = inlined_call_operand.vmem [shape: bf16[96,160], index: 1, kind: input, shape index: {}]   ;;  %s1900_s6 = inlined_call_operand.vmem [shape: f32[1,128], index: 6, kind: input, shape index: {}]   ;;  %s1901_s2 = inlined_call_operand.vmem [shape: bf16[384,128], index: 2, kind: input, shape index: {}]   ;;  %s1902_s5 = inlined_call_operand.vmem [shape: f32[1,128], index: 5, kind: input, shape index: {}]   ;;  %s1903_s8 = inlined_call_operand.vmem [shape: f32[1,128], index: 8, kind: input, shape index: {}]   ;;  %s1904_s3 = inlined_call_operand.vmem [shape: bf16[384,32], index: 3, kind: input, shape index: {}]   ;;  %s1905_s7 = inlined_call_operand.vmem [shape: f32[1,128], index: 7, kind: input, shape index: {}]   ;;  %s1906_s4 = inlined_call_operand.vmem [shape: f32[1,32], index: 4, kind: input, shape index: {}]   ;;  %s1907_s9 = inlined_call_operand.vmem [shape: f32[32,32], index: 9, kind: output, shape index: {}, may-alias: {0,9}]  }
   0x1   :  { %v1480_v1 = vld [vmem:[%s1898_s0] sm:$0xff]  ;;  %v1485_v2 = vld [vmem:[%s1898_s0 + $0x8] sm:$0xff]  ;;  %v1490_v3 = vld [vmem:[%s1898_s0 + $0x10] sm:$0xff]  ;;  %vm375_vm8 = vcmask 785408  }
   0x2   :  { %v261_v4 = vpack.c.bf16 %v1480_v1, %v1480_v1  ;;  %v262_v5 = vpack.c.bf16 %v1485_v2, %v1485_v2  ;;  %v1496_v6 = vshrl.u32 %v150_v0, 7  ;;  %v244_v7 = vrot.slane %v1480_v1, 1  ;;  %v1502_v8 = vld [vmem:[%s1898_s0 + $0x18] sm:$0xff]  ;;  %v1149_v13 = vld [vmem:[%s1899_s1 + $0x50] sm:$0xf] }
   0x3   :  { %v245_v9 = vrot.slane %v1485_v2, 1  ;;  %v246_v10 = vrot.slane %v1490_v3, 1  ;;  %v263_v11 = vpack.c.bf16 %v1490_v3, %v1490_v3  ;;  %v264_v12 = vpack.c.bf16 %v1502_v8, %v1502_v8  ;;  %v1362_v14 = vld [vmem:[%s1899_s1 + $0x54] sm:$0xf0]  ;;  %v1361_v18 = vld [vmem:[%s1899_s1 + $0x54] sm:$0xf] }
   0x4   :  { %v279_v15 = vunpack.c.l.b16 %v261_v4  ;;  %v280_v16 = vunpack.c.l.b16 %v262_v5  ;;  %v152_v17 = vadd.s32 8, %v1496_v6  ;;  %vm248_vm0 = vcmp.lt.s32.totalorder %v1496_v6, 7  ;;  %v1151_v19 = vld [vmem:[%s1899_s1 + $0x58] sm:$0xf0]  ;;  %v1141_v27 = vld [vmem:[%s1899_s1 + $0x40] sm:$0xf] }
   0x5   :  { %v251_v20 = vsel %vm248_vm0, %v244_v7, %v245_v9  ;;  %v281_v21 = vunpack.c.l.b16 %v263_v11  ;;  %v282_v22 = vunpack.c.l.b16 %v264_v12  ;;  %v250_v25 = vsel %vm248_vm0, %v245_v9, %v246_v10  ;;  %v1360_v28 = vld [vmem:[%s1899_s1 + $0x44] sm:$0xf0]  ;;  %v1359_v33 = vld [vmem:[%s1899_s1 + $0x44] sm:$0xf]  ;;  %v1143_v34 = vld [vmem:[%s1899_s1 + $0x48] sm:$0xf0] }
   0x6   :  { %v283_v23 = vpack.c.b16 %v280_v16, %v279_v15  ;;  %v166_v24 = vand.u32 15, %v152_v17  ;;  %v154_v26 = vadd.s32 24, %v1496_v6  ;;  %v247_v30 = vrot.slane %v1502_v8, 1  ;;  %v1133_v45 = vld [vmem:[%s1899_s1 + $0x30] sm:$0xf] }
   0x7   :  { %v284_v29 = vpack.c.b16 %v282_v22, %v281_v21  ;;  %v1150_v31 = vor.u32 %v1362_v14, %v1149_v13  ;;  %v1154_v32 = vor.u32 %v1361_v18, %v1151_v19  ;;  %v257_v35 = vpack.c.bf16 %v251_v20, %v251_v20  ;;  %v1358_v46 = vld [vmem:[%s1899_s1 + $0x34] sm:$0xf0]  ;;  %v1357_v48 = vld [vmem:[%s1899_s1 + $0x34] sm:$0xf]  ;;  %v1135_v49 = vld [vmem:[%s1899_s1 + $0x38] sm:$0xf0] }
   0x8   :  { %285 = vrot.lane.b32.xlu0 %v283_v23, %s1424_s12  ;;  %vm216_vm1 = vcmp.ne.s32.totalorder %v166_v24, 15  ;;  %v180_v36 = vand.u32 15, %v154_v26  ;;  %v249_v39 = vsel %vm248_vm0, %v246_v10, %v247_v30  ;;  %v252_v40 = vsel %vm248_vm0, %v247_v30, %v244_v7  ;;  %v1125_v58 = vld [vmem:[%s1899_s1 + $0x20] sm:$0xf]  ;;  %v1356_v59 = vld [vmem:[%s1899_s1 + $0x24] sm:$0xf0] }
   0x9   :  { %v1543_v38 = vsel %vm216_vm1, 1.0, %v1425_v37  ;;  %287 = vrot.lane.b32.xlu1 %v284_v29, %s1424_s12  ;;  %382 = vmatpush.bf16.msra.mxu0 %v1150_v31  ;;  %v1142_v41 = vor.u32 %v1360_v28, %v1141_v27  ;;  %v259_v43 = vpack.c.bf16 %v249_v39, %v249_v39  ;;  %v1146_v44 = vor.u32 %v1359_v33, %v1143_v34  ;;  %v1355_v60 = vld [vmem:[%s1899_s1 + $0x24] sm:$0xf]  ;;  %v1127_v61 = vld [vmem:[%s1899_s1 + $0x28] sm:$0xf0] }
   0xa   :  { %v254_v42 = vmul.f32 %v1543_v38, %v250_v25  ;;  %vm218_vm2 = vcmp.ne.s32.totalorder %v180_v36, 15  ;;  %401 = vmatpush.bf16.msra.mxu1 %v1154_v32  ;;  %v293_v51 = vunpack.c.l.b16 %v257_v35  ;;  %v1134_v53 = vor.u32 %v1358_v46, %v1133_v45  ;;  %v1117_v7 = vld [vmem:[%s1899_s1 + $0x10] sm:$0xf]  ;;  %v1354_v9 = vld [vmem:[%s1899_s1 + $0x14] sm:$0xf0] }
   0xb   :  { %v1557_v47 = vsel %vm218_vm2, 1.0, %v1425_v37  ;;  %v295_v56 = vunpack.c.l.b16 %v259_v43  ;;  %v1138_v57 = vor.u32 %v1357_v48, %v1135_v49  ;;  %v1126_v0 = vor.u32 %v1356_v59, %v1125_v58  ;;  %v1353_v10 = vld [vmem:[%s1899_s1 + $0x14] sm:$0xf]  ;;  %v1119_v12 = vld [vmem:[%s1899_s1 + $0x18] sm:$0xf0] }
   0xc   :  { %v258_v50 = vpack.c.bf16 %v254_v42, %v254_v42  ;;  %v256_v52 = vmul.f32 %v1557_v47, %v252_v40  ;;  %v1130_v5 = vor.u32 %v1355_v60, %v1127_v61  ;;  %v1118_v11 = vor.u32 %v1354_v9, %v1117_v7  ;;  %v1109_v13 = vld [vmem:[%s1899_s1] sm:$0xf]  ;;  %v1352_v14 = vld [vmem:[%s1899_s1 + $0x4] sm:$0xf0]  ;;  %v1351_v16 = vld [vmem:[%s1899_s1 + $0x4] sm:$0xf] }
   0xd   :  { %383 = vmatpush.bf16.msra.mxu0 %v1142_v41  ;;  %v1122_v15 = vor.u32 %v1353_v10, %v1119_v12  ;;  %v1111_v17 = vld [vmem:[%s1899_s1 + $0x8] sm:$0xf0]  ;;  %v1110_v18 = vor.u32 %v1352_v14, %v1109_v13  ;;  %v159_v20 = vand.u32 15, %v1496_v6  ;;  %v230_v21 = vrot.slane %v1502_v8, 7  ;;  %v1377_v7 = vld [vmem:[%s1901_s2 + $0x70] sm:$0xff]  ;;  %v1370_v12 = vld [vmem:[%s1901_s2 + $0x38] sm:$0xff] }
   0xe   :  { %v294_v54 = vunpack.c.l.b16 %v258_v50  ;;  %v260_v55 = vpack.c.bf16 %v256_v52, %v256_v52  ;;  %402 = vmatpush.bf16.msra.mxu1 %v1146_v44  ;;  %v1114_v19 = vor.u32 %v1351_v16, %v1111_v17  ;;  %v227_v22 = vrot.slane %v1480_v1, 7  ;;  %v1386_v13 = vld [vmem:[%s1901_s2 + $0xb8] sm:$0xff]  ;;  %692 = vmatpush.bf16.msra.mxu2 %v1370_v12  ;;  %v1376_v17 = vld [vmem:[%s1901_s2 + $0x68] sm:$0xff] }
   0xf   :  { %vm203_vm3 = vcmp.ne.s32.totalorder %v159_v20, 0  ;;  %vm231_vm4 = vcmp.lt.s32.totalorder %v1496_v6, 1  ;;  %v228_v24 = vrot.slane %v1485_v2, 7  ;;  %v153_v27 = vadd.s32 16, %v1496_v6  ;;  %v1369_v20 = vld [vmem:[%s1901_s2 + $0x30] sm:$0xff] }
  0x10   :  { %v297_v62 = vpack.c.b16 %v294_v54, %v293_v51  ;;  %v296_v63 = vunpack.c.l.b16 %v260_v55  ;;  %v1607_v23 = vsel %vm203_vm3, 1.0, %v1425_v37  ;;  %v235_v25 = vsel %vm231_vm4, %v230_v21, %v227_v22 }
  0x11   :  { %384 = vmatpush.bf16.msra.mxu0 %v1134_v53  ;;  %v236_v26 = vmul.f32 %v1607_v23, %v235_v25  ;;  %v234_v8 = vsel %vm231_vm4, %v227_v22, %v228_v24  ;;  %v173_v30 = vand.u32 15, %v153_v27  ;;  %v229_v32 = vrot.slane %v1490_v3, 7  ;;  %v1375_v25 = vld [vmem:[%s1901_s2 + $0x60] sm:$0xff]  ;;  %v1368_v27 = vld [vmem:[%s1901_s2 + $0x28] sm:$0xff] }
  0x12   :  { %299 = vrot.lane.b32.xlu0 %v297_v62, %s1426_s29  ;;  %v298_v4 = vpack.c.b16 %v296_v63, %v295_v56  ;;  %403 = vmatpush.bf16.msra.mxu1 %v1138_v57  ;;  %v241_v29 = vpack.c.bf16 %v234_v8, %v234_v8  ;;  %v1384_v8 = vld [vmem:[%s1901_s2 + $0xa8] sm:$0xff] }
  0x13   :  { %v240_v28 = vpack.c.bf16 %v236_v26, %v236_v26  ;;  %vm205_vm5 = vcmp.ne.s32.totalorder %v173_v30, 0  ;;  %v233_v35 = vsel %vm231_vm4, %v228_v24, %v229_v32  ;;  %v232_v40 = vsel %vm231_vm4, %v229_v32, %v230_v21  ;;  %v1385_v21 = vld [vmem:[%s1901_s2 + $0xb0] sm:$0xff]  ;;  %693 = vmatpush.bf16.msra.mxu2 %v1369_v20  ;;  %v1383_v32 = vld [vmem:[%s1901_s2 + $0xa0] sm:$0xff] }
  0x14   :  { %301 = vrot.lane.b32.xlu1 %v298_v4, %s1426_s29  ;;  %v270_v34 = vunpack.c.l.b16 %v241_v29  ;;  %v1618_v2 = vsel %vm205_vm5, 1.0, %v1425_v37  ;;  %v243_v37 = vpack.c.bf16 %v232_v40, %v232_v40  ;;  %v1374_v29 = vld [vmem:[%s1901_s2 + $0x58] sm:$0xff] }
  0x15   :  { %385 = vmatpush.bf16.msra.mxu0 %v1126_v0  ;;  %v269_v33 = vunpack.c.l.b16 %v240_v28  ;;  %v238_v39 = vmul.f32 %v1618_v2, %v233_v35  ;;  %v1378_v0 = vld [vmem:[%s1901_s2 + $0x78] sm:$0xff] }
  0x16   :  { %404 = vmatpush.bf16.msra.mxu1 %v1130_v5  ;;  %v272_v46 = vunpack.c.l.b16 %v243_v37  ;;  %711 = vmatpush.bf16.msra.mxu3 %v1378_v0  ;;  %v1371_v37 = vld [vmem:[%s1901_s2 + $0x40] sm:$0xff] }
  0x17   :  { %v273_v36 = vpack.c.b16 %v270_v34, %v269_v33  ;;  %v242_v43 = vpack.c.bf16 %v238_v39, %v238_v39  ;;  %694 = vmatpush.bf16.msra.mxu2 %v1368_v27  ;;  %v1373_v34 = vld [vmem:[%s1901_s2 + $0x50] sm:$0xff]  ;;  %v1382_v39 = vld [vmem:[%s1901_s2 + $0x98] sm:$0xff] }
  0x19   :  { %386 = vmatpush.bf16.msra.mxu0 %v1118_v11  ;;  %v271_v45 = vunpack.c.l.b16 %v242_v43  ;;  %v1381_v43 = vld [vmem:[%s1901_s2 + $0x90] sm:$0xff] }
  0x1a   :  { %405 = vmatpush.bf16.msra.mxu1 %v1122_v15  ;;  %712 = vmatpush.bf16.msra.mxu3 %v1377_v7 }
  0x1b   :  { %v274_v48 = vpack.c.b16 %v272_v46, %v271_v45  ;;  %v1364_v45 = vld [vmem:[%s1901_s2 + $0x8] sm:$0xff] }
  0x1c   :  { %v1380_v46 = vld [vmem:[%s1901_s2 + $0x88] sm:$0xff] }
  0x1d   :  { %387 = vmatpush.bf16.msra.mxu0 %v1110_v18 }
  0x1e   :  { %406 = vmatpush.bf16.msra.mxu1 %v1114_v19  ;;  %713 = vmatpush.bf16.msra.mxu3 %v1376_v17 }
  0x21   :  { %730 = vmatpush.bf16.msrb.mxu0 %v1386_v13 }
  0x22   :  { %714 = vmatpush.bf16.msra.mxu3 %v1375_v25 }
  0x25   :  { %731 = vmatpush.bf16.msrb.mxu0 %v1385_v21 }
  0x26   :  { %715 = vmatpush.bf16.msra.mxu3 %v1374_v29 }
  0x29   :  { %732 = vmatpush.bf16.msrb.mxu0 %v1384_v8 }
  0x2a   :  { %716 = vmatpush.bf16.msra.mxu3 %v1373_v34 }
  0x2d   :  { %733 = vmatpush.bf16.msrb.mxu0 %v1383_v32 }
  0x31   :  { %734 = vmatpush.bf16.msrb.mxu0 %v1382_v39 }
  0x35   :  { %735 = vmatpush.bf16.msrb.mxu0 %v1381_v43 }
  0x39   :  { %736 = vmatpush.bf16.msrb.mxu0 %v1380_v46 }
  0x7a   :  { %v286_v31 = vpop.permute.xlu0 %285 }
  0x7b   :  { %v306_v3 = vsel %vm303_vm6, %v273_v36, %v286_v31  ;;  %v288_v44 = vpop.permute.xlu1 %287  ;;  %v1367_v31 = vld [vmem:[%s1901_s2 + $0x20] sm:$0xff]  ;;  %v1366_v36 = vld [vmem:[%s1901_s2 + $0x18] sm:$0xff] }
  0x7c   :  { %v309_v49 = vsel %vm303_vm6, %v274_v48, %v288_v44  ;;  %695 = vmatpush.bf16.msra.mxu2 %v1367_v31 }
  0x80   :  { %696 = vmatpush.bf16.msra.mxu2 %v1366_v36 }
  0x84   :  { %v300_v41 = vpop.permute.xlu0 %299 }
  0x85   :  { %v312_v42 = vsel %vm310_vm7, %v306_v3, %v300_v41  ;;  %v1372_v3 = vld [vmem:[%s1901_s2 + $0x48] sm:$0xff] }
  0x86   :  { %1155 = vmatmul.msk.bf16.vlgmr.msra.gmra.mxu0 %vm375_vm8, %v312_v42  ;;  %1157 = vmatmul.msk.bf16.vlgmr.msra.gmra.mxu1 %vm375_vm8, %v312_v42  ;;  %v302_v50 = vpop.permute.xlu1 %301  ;;  %v1365_v42 = vld [vmem:[%s1901_s2 + $0x10] sm:$0xff] }
  0x87   :  { %v314_v51 = vsel %vm310_vm7, %v309_v49, %v302_v50  ;;  %717 = vmatpush.bf16.msra.mxu3 %v1372_v3  ;;  %697 = vmatpush.bf16.msra.mxu2 %v1365_v42  ;;  %v1363_v49 = vld [vmem:[%s1901_s2] sm:$0xff] }
  0x88   :  { %v1379_v50 = vld [vmem:[%s1901_s2 + $0x80] sm:$0xff] }
  0x89   :  { %737 = vmatpush.bf16.msrb.mxu0 %v1379_v50 }
  0x8b   :  { %718 = vmatpush.bf16.msra.mxu3 %v1371_v37  ;;  %698 = vmatpush.bf16.msra.mxu2 %v1364_v45 }
  0x8f   :  { %699 = vmatpush.bf16.msra.mxu2 %v1363_v49 }
  0x96   :  { %1156 = vmatmul.msk.bf16.gmra.mxu0 %vm375_vm8, %v314_v51  ;;  %1158 = vmatmul.msk.bf16.gmra.mxu1 %vm375_vm8, %v314_v51 }
 0x103   :  { %v389_v52 = vpop.f32.mrf.mxu0 }
 0x10b   :  { %v391_v53 = vpop.f32.mrf.mxu0 }
 0x10c   :  { %v418_v55 = vadd.f32 %v391_v53, %v389_v52 }
 0x113   :  { %v394_v54 = vpop.f32.mrf.mxu0 }
 0x114   :  { %v419_v56 = vadd.f32 %v418_v55, %v394_v54 }
 0x11b   :  { %v396_v57 = vpop.f32.mrf.mxu0 }
 0x11c   :  { %v420_v58 = vadd.f32 %v419_v56, %v396_v57  ;;  %v146_v56 = vld [vmem:[%s1902_s5] sm:$0x1] }
 0x11e   :  { %v421_v59 = vrot.slane %v420_v58, 4 }
 0x120   :  { %v422_v60 = vadd.f32 %v421_v59, %v420_v58 }
 0x122   :  { %v423_v61 = vrot.slane %v422_v60, 2 }
 0x124   :  { %v424_v62 = vadd.f32 %v423_v61, %v422_v60  ;;  %v1414_v61 = vld [vmem:[%s1900_s6] ss:$0 sm:$0xff] }
 0x126   :  { %v425_v63 = vrot.slane %v424_v62, 1 }
 0x128   :  { %v426_v4 = vadd.f32 %v425_v63, %v424_v62 }
 0x12a   :  { %v427_v5 = vmul.f32 0.03125, %v426_v4 }
 0x12c   :  { %v1639_v9 = vsub.f32 %v389_v52, %v427_v5  ;;  %v1641_v10 = vsub.f32 %v391_v53, %v427_v5  ;;  %v1643_v11 = vsub.f32 %v394_v54, %v427_v5  ;;  %v1651_v14 = vsub.f32 %v396_v57, %v427_v5 }
 0x12e   :  { %v432_v15 = vmul.f32 %v1639_v9, %v1639_v9  ;;  %v433_v16 = vmul.f32 %v1641_v10, %v1641_v10  ;;  %v434_v18 = vmul.f32 %v1643_v11, %v1643_v11  ;;  %v435_v22 = vmul.f32 %v1651_v14, %v1651_v14 }
 0x130   :  { %v436_v19 = vadd.f32 %v433_v16, %v432_v15 }
 0x132   :  { %v437_v24 = vadd.f32 %v436_v19, %v434_v18 }
 0x134   :  { %v438_v26 = vadd.f32 %v437_v24, %v435_v22 }
 0x136   :  { %v439_v28 = vrot.slane %v438_v26, 4 }
 0x138   :  { %v440_v30 = vadd.f32 %v439_v28, %v438_v26 }
 0x13a   :  { %v441_v33 = vrot.slane %v440_v30, 2 }
 0x13c   :  { %v442_v35 = vadd.f32 %v441_v33, %v440_v30 }
 0x13e   :  { %v443_v40 = vrot.slane %v442_v35, 1 }
 0x140   :  { %v444_v41 = vadd.f32 %v443_v40, %v442_v35 }
 0x142   :  { %v445_v44 = vmul.f32 0.03125, %v444_v41 }
 0x144   :  { %v446_v48 = vadd.f32 1e-05, %v445_v44 }
 0x146   :  { %1417 = vrsqrt.f32 %v446_v48  ;;  %vm453_vm10 = vweird.f32 %v446_v48 }
 0x14c   :  { %v1418_v51 = vpop.eup %1417 }
 0x14d   :  { %v448_v52 = vmul.f32 %v1418_v51, %v446_v48  ;;  %vm454_vm9 = vweird.f32 %v1418_v51 }
 0x14e   :  { %vm455_vm11 = vmor %vm453_vm10, %vm454_vm9 }
 0x14f   :  { %v449_v53 = vmul.f32 %v1418_v51, %v448_v52 }
 0x151   :  { %v450_v54 = vmul.f32 0.5, %v449_v53 }
 0x153   :  { %v451_v55 = vsub.f32 1.5, %v450_v54 }
 0x155   :  { %v452_v57 = vmul.f32 %v1418_v51, %v451_v55 }
 0x157   :  { %v456_v58 = vsel %vm455_vm11, %v1418_v51, %v452_v57 }
 0x158   :  { %v457_v59 = vmul.f32 %v456_v58, %v146_v56 }
 0x15a   :  { %v459_v60 = vperm.slane %v457_v59, 0 }
 0x15c   :  { %v463_v62 = vmul.f32 %v459_v60, %v1643_v11  ;;  %v464_v63 = vmul.f32 %v459_v60, %v1651_v14  ;;  %v461_v0 = vmul.f32 %v459_v60, %v1639_v9  ;;  %v462_v4 = vmul.f32 %v459_v60, %v1641_v10 }
 0x15e   :  { %v470_v5 = vadd.f32 %v1414_v61, %v463_v62  ;;  %v471_v7 = vadd.f32 %v1414_v61, %v464_v63  ;;  %v468_v12 = vadd.f32 %v1414_v61, %v461_v0  ;;  %v469_v13 = vadd.f32 %v1414_v61, %v462_v4 }
 0x160   :  { %v474_v15 = vmax.f32 %v470_v5, 0.0  ;;  %v475_v16 = vmax.f32 %v471_v7, 0.0  ;;  %v472_v17 = vmax.f32 %v468_v12, 0.0  ;;  %v473_v18 = vmax.f32 %v469_v13, 0.0 }
 0x162   :  { %v508_v19 = vpack.c.bf16 %v472_v17, %v472_v17  ;;  %v509_v20 = vpack.c.bf16 %v473_v18, %v473_v18  ;;  %v476_v21 = vrot.slane %v472_v17, 7  ;;  %v477_v22 = vrot.slane %v473_v18, 7 }
 0x163   :  { %v479_v24 = vrot.slane %v475_v16, 7  ;;  %v492_v11 = vrot.slane %v472_v17, 1  ;;  %v493_v25 = vrot.slane %v473_v18, 1  ;;  %v494_v14 = vrot.slane %v474_v15, 1 }
 0x164   :  { %v528_v26 = vunpack.c.l.b16 %v508_v19  ;;  %v529_v9 = vunpack.c.l.b16 %v509_v20  ;;  %v482_v10 = vsel %vm231_vm4, %v476_v21, %v477_v22  ;;  %v478_v36 = vrot.slane %v474_v15, 7 }
 0x165   :  { %v483_v27 = vsel %vm231_vm4, %v479_v24, %v476_v21  ;;  %v489_v8 = vpack.c.bf16 %v482_v10, %v482_v10  ;;  %v497_v28 = vsel %vm248_vm0, %v493_v25, %v494_v14  ;;  %v498_v29 = vsel %vm248_vm0, %v492_v11, %v493_v25 }
 0x166   :  { %v532_v30 = vpack.c.b16 %v529_v9, %v528_v26  ;;  %v484_v31 = vmul.f32 %v1607_v23, %v483_v27  ;;  %v501_v32 = vmul.f32 %v1543_v38, %v497_v28  ;;  %v504_v33 = vpack.c.bf16 %v498_v29, %v498_v29 }
 0x167   :  { %v495_v39 = vrot.slane %v475_v16, 1  ;;  %v517_v3 = vunpack.c.l.b16 %v489_v8  ;;  %v481_v44 = vsel %vm231_vm4, %v477_v22, %v478_v36  ;;  %v510_v46 = vpack.c.bf16 %v474_v15, %v474_v15 }
 0x168   :  { %719 = vmatmul.bf16.vlgmr.msra.gmra.mxu3 %v532_v30  ;;  %v488_v34 = vpack.c.bf16 %v484_v31, %v484_v31  ;;  %v505_v35 = vpack.c.bf16 %v501_v32, %v501_v32  ;;  %v540_v41 = vunpack.c.l.b16 %v504_v33  ;;  %v511_v48 = vpack.c.bf16 %v475_v16, %v475_v16 }
 0x169   :  { %v499_v45 = vsel %vm248_vm0, %v495_v39, %v492_v11  ;;  %v486_v49 = vmul.f32 %v1618_v2, %v481_v44  ;;  %v530_v51 = vunpack.c.l.b16 %v510_v46  ;;  %v480_v53 = vsel %vm231_vm4, %v478_v36, %v479_v24 }
 0x16a   :  { %v516_v40 = vunpack.c.l.b16 %v488_v34  ;;  %v541_v42 = vunpack.c.l.b16 %v505_v35  ;;  %v503_v50 = vmul.f32 %v1557_v47, %v499_v45  ;;  %v531_v52 = vunpack.c.l.b16 %v511_v48 }
 0x16b   :  { %v496_v54 = vsel %vm248_vm0, %v494_v14, %v495_v39  ;;  %v490_v55 = vpack.c.bf16 %v486_v49, %v486_v49  ;;  %v491_v58 = vpack.c.bf16 %v480_v53, %v480_v53  ;;  %v1401_v49 = vld [vmem:[%s1904_s3 + $0x70] sm:$0xff] }
 0x16c   :  { %v520_v43 = vpack.c.b16 %v517_v3, %v516_v40  ;;  %v544_v37 = vpack.c.b16 %v541_v42, %v540_v41  ;;  %v507_v56 = vpack.c.bf16 %v503_v50, %v503_v50  ;;  %v533_v57 = vpack.c.b16 %v531_v52, %v530_v51  ;;  %v1410_v50 = vld [vmem:[%s1904_s3 + $0xb8] sm:$0xff] }
 0x16d   :  { %v506_v59 = vpack.c.bf16 %v496_v54, %v496_v54  ;;  %v518_v60 = vunpack.c.l.b16 %v490_v55  ;;  %v519_v62 = vunpack.c.l.b16 %v491_v58  ;;  %v1394_v51 = vld [vmem:[%s1904_s3 + $0x38] sm:$0xff]  ;;  %1061 = vmatpush.bf16.msrb.mxu3 %v1410_v50  ;;  %v1400_v54 = vld [vmem:[%s1904_s3 + $0x68] sm:$0xff]  ;;  %v1409_v55 = vld [vmem:[%s1904_s3 + $0xb0] sm:$0xff] }
 0x16e   :  { %700 = vmatmul.bf16.vlgmr.msra.gmra.mxu2 %v520_v43  ;;  %738 = vmatmul.bf16.vlgmr.msrb.gmra.mxu0 %v544_v37  ;;  %v543_v61 = vunpack.c.l.b16 %v507_v56  ;;  %v1402_v37 = vld [vmem:[%s1904_s3 + $0x78] sm:$0xff]  ;;  %v1393_v56 = vld [vmem:[%s1904_s3 + $0x30] sm:$0xff] }
 0x16f   :  { %v542_v63 = vunpack.c.l.b16 %v506_v59  ;;  %v521_v0 = vpack.c.b16 %v519_v62, %v518_v60  ;;  %1042 = vmatpush.bf16.msrb.mxu2 %v1402_v37  ;;  %1023 = vmatpush.bf16.msrb.mxu1 %v1394_v51  ;;  %v1399_v59 = vld [vmem:[%s1904_s3 + $0x60] sm:$0xff]  ;;  %v1408_v60 = vld [vmem:[%s1904_s3 + $0xa8] sm:$0xff] }
 0x171   :  { %v545_v4 = vpack.c.b16 %v543_v61, %v542_v63  ;;  %1062 = vmatpush.bf16.msrb.mxu3 %v1409_v55  ;;  %v1392_v61 = vld [vmem:[%s1904_s3 + $0x28] sm:$0xff] }
 0x173   :  { %1043 = vmatpush.bf16.msrb.mxu2 %v1401_v49  ;;  %1024 = vmatpush.bf16.msrb.mxu1 %v1393_v56 }
 0x175   :  { %1063 = vmatpush.bf16.msrb.mxu3 %v1408_v60 }
 0x177   :  { %1044 = vmatpush.bf16.msrb.mxu2 %v1400_v54  ;;  %1025 = vmatpush.bf16.msrb.mxu1 %v1392_v61 }
 0x178   :  { %724 = vmatmul.bf16.gmra.mxu3 %v533_v57 }
 0x17b   :  { %1045 = vmatpush.bf16.msrb.mxu2 %v1399_v59 }
 0x17e   :  { %705 = vmatmul.bf16.gmra.mxu2 %v521_v0  ;;  %743 = vmatmul.bf16.gmra.mxu0 %v545_v4  ;;  %v1398_v0 = vld [vmem:[%s1904_s3 + $0x58] sm:$0xff]  ;;  %v1407_v4 = vld [vmem:[%s1904_s3 + $0xa0] sm:$0xff] }
 0x17f   :  { %1046 = vmatpush.bf16.msrb.mxu2 %v1398_v0  ;;  %1064 = vmatpush.bf16.msrb.mxu3 %v1407_v4 }
 0x1eb   :  { %v720_v5 = vpop.f32.mrf.mxu3  ;;  %v739_v7 = vpop.f32.mrf.mxu0 }
 0x1f1   :  { %v701_v12 = vpop.f32.mrf.mxu2 }
 0x1f2   :  { %v721_v21 = vadd.f32 %v720_v5, %v701_v12  ;;  %v1391_v5 = vld [vmem:[%s1904_s3 + $0x20] sm:$0xff]  ;;  %v1397_v12 = vld [vmem:[%s1904_s3 + $0x50] sm:$0xff] }
 0x1f3   :  { %v722_v13 = vpop.f32.mrf.mxu3  ;;  %v741_v15 = vpop.f32.mrf.mxu0  ;;  %1026 = vmatpush.bf16.msrb.mxu1 %v1391_v5  ;;  %1047 = vmatpush.bf16.msrb.mxu2 %v1397_v12 }
 0x1f4   :  { %v740_v11 = vadd.f32 %v739_v7, %v721_v21  ;;  %v1395_v21 = vld [vmem:[%s1904_s3 + $0x40] sm:$0xff] }
 0x1f9   :  { %v703_v16 = vpop.f32.mrf.mxu2 }
 0x1fa   :  { %v723_v20 = vadd.f32 %v722_v13, %v703_v16  ;;  %v1406_v13 = vld [vmem:[%s1904_s3 + $0x98] sm:$0xff] }
 0x1fb   :  { %v725_v17 = vpop.f32.mrf.mxu3  ;;  %v744_v18 = vpop.f32.mrf.mxu0  ;;  %1065 = vmatpush.bf16.msrb.mxu3 %v1406_v13 }
 0x1fc   :  { %v742_v24 = vadd.f32 %v741_v15, %v723_v20  ;;  %v1390_v15 = vld [vmem:[%s1904_s3 + $0x18] sm:$0xff]  ;;  %v1389_v20 = vld [vmem:[%s1904_s3 + $0x10] sm:$0xff] }
 0x1fd   :  { %1027 = vmatpush.bf16.msrb.mxu1 %v1390_v15 }
 0x1fe   :  { %v749_v9 = vadd.f32 %v742_v24, %v740_v11 }
 0x201   :  { %v706_v19 = vpop.f32.mrf.mxu2  ;;  %1028 = vmatpush.bf16.msrb.mxu1 %v1389_v20 }
 0x202   :  { %v726_v22 = vadd.f32 %v725_v17, %v706_v19  ;;  %v1405_v19 = vld [vmem:[%s1904_s3 + $0x90] sm:$0xff] }
 0x203   :  { %v727_v14 = vpop.f32.mrf.mxu3  ;;  %v746_v27 = vpop.f32.mrf.mxu0  ;;  %1066 = vmatpush.bf16.msrb.mxu3 %v1405_v19 }
 0x204   :  { %v745_v25 = vadd.f32 %v744_v18, %v726_v22  ;;  %v1396_v18 = vld [vmem:[%s1904_s3 + $0x48] sm:$0xff] }
 0x205   :  { %1048 = vmatpush.bf16.msrb.mxu2 %v1396_v18  ;;  %v1404_v22 = vld [vmem:[%s1904_s3 + $0x88] sm:$0xff] }
 0x206   :  { %v750_v8 = vadd.f32 %v749_v9, %v745_v25 }
 0x207   :  { %1067 = vmatpush.bf16.msrb.mxu3 %v1404_v22 }
 0x209   :  { %v708_v26 = vpop.f32.mrf.mxu2  ;;  %1049 = vmatpush.bf16.msrb.mxu2 %v1395_v21 }
 0x20a   :  { %v728_v10 = vadd.f32 %v727_v14, %v708_v26  ;;  %v1403_v14 = vld [vmem:[%s1904_s3 + $0x80] sm:$0xff] }
 0x20b   :  { %v1387_v26 = vld [vmem:[%s1904_s3] sm:$0xff]  ;;  %1068 = vmatpush.bf16.msrb.mxu3 %v1403_v14 }
 0x20c   :  { %v747_v28 = vadd.f32 %v746_v27, %v728_v10 }
 0x20e   :  { %v751_v29 = vadd.f32 %v750_v8, %v747_v28  ;;  %v148_v8 = vld [vmem:[%s1905_s7] sm:$0x1] }
 0x210   :  { %v752_v30 = vrot.slane %v751_v29, 4 }
 0x212   :  { %v753_v31 = vadd.f32 %v752_v30, %v751_v29 }
 0x214   :  { %v754_v32 = vrot.slane %v753_v31, 2 }
 0x216   :  { %v755_v33 = vadd.f32 %v754_v32, %v753_v31  ;;  %v1415_v32 = vld [vmem:[%s1903_s8] ss:$0 sm:$0xff] }
 0x218   :  { %v756_v34 = vrot.slane %v755_v33, 1 }
 0x21a   :  { %v757_v35 = vadd.f32 %v756_v34, %v755_v33 }
 0x21c   :  { %v758_v36 = vmul.f32 0.03125, %v757_v35 }
 0x21e   :  { %v1751_v39 = vsub.f32 %v740_v11, %v758_v36  ;;  %v1753_v40 = vsub.f32 %v742_v24, %v758_v36  ;;  %v1755_v3 = vsub.f32 %v745_v25, %v758_v36  ;;  %v1757_v41 = vsub.f32 %v747_v28, %v758_v36  ;;  %v1388_v24 = vld [vmem:[%s1904_s3 + $0x8] sm:$0xff] }
 0x21f   :  { %1029 = vmatpush.bf16.msrb.mxu1 %v1388_v24 }
 0x220   :  { %v763_v42 = vmul.f32 %v1751_v39, %v1751_v39  ;;  %v764_v43 = vmul.f32 %v1753_v40, %v1753_v40  ;;  %v765_v44 = vmul.f32 %v1755_v3, %v1755_v3  ;;  %v766_v46 = vmul.f32 %v1757_v41, %v1757_v41 }
 0x222   :  { %v767_v45 = vadd.f32 %v764_v43, %v763_v42 }
 0x223   :  { %1030 = vmatpush.bf16.msrb.mxu1 %v1387_v26 }
 0x224   :  { %v768_v48 = vadd.f32 %v767_v45, %v765_v44 }
 0x226   :  { %v769_v52 = vadd.f32 %v768_v48, %v766_v46 }
 0x228   :  { %v770_v53 = vrot.slane %v769_v52, 4 }
 0x22a   :  { %v771_v57 = vadd.f32 %v770_v53, %v769_v52 }
 0x22c   :  { %v772_v58 = vrot.slane %v771_v57, 2 }
 0x22e   :  { %v773_v62 = vadd.f32 %v772_v58, %v771_v57 }
 0x230   :  { %v774_v63 = vrot.slane %v773_v62, 1 }
 0x232   :  { %v775_v7 = vadd.f32 %v774_v63, %v773_v62 }
 0x234   :  { %v776_v16 = vmul.f32 0.03125, %v775_v7 }
 0x236   :  { %v777_v17 = vadd.f32 1e-05, %v776_v16 }
 0x238   :  { %1419 = vrsqrt.f32 %v777_v17  ;;  %vm784_vm13 = vweird.f32 %v777_v17 }
 0x23e   :  { %v1420_v11 = vpop.eup %1419 }
 0x23f   :  { %v779_v25 = vmul.f32 %v1420_v11, %v777_v17  ;;  %vm785_vm12 = vweird.f32 %v1420_v11 }
 0x240   :  { %vm786_vm14 = vmor %vm784_vm13, %vm785_vm12 }
 0x241   :  { %v780_v9 = vmul.f32 %v1420_v11, %v779_v25 }
 0x243   :  { %v781_v10 = vmul.f32 0.5, %v780_v9 }
 0x245   :  { %v782_v27 = vsub.f32 1.5, %v781_v10 }
 0x247   :  { %v783_v28 = vmul.f32 %v1420_v11, %v782_v27 }
 0x249   :  { %v787_v29 = vsel %vm786_vm14, %v1420_v11, %v783_v28 }
 0x24a   :  { %v788_v30 = vmul.f32 %v787_v29, %v148_v8 }
 0x24c   :  { %v790_v31 = vperm.slane %v788_v30, 0 }
 0x24e   :  { %v794_v33 = vmul.f32 %v790_v31, %v1755_v3  ;;  %v795_v34 = vmul.f32 %v790_v31, %v1757_v41  ;;  %v792_v35 = vmul.f32 %v790_v31, %v1751_v39  ;;  %v793_v36 = vmul.f32 %v790_v31, %v1753_v40 }
 0x250   :  { %v802_v42 = vadd.f32 %v1415_v32, %v795_v34  ;;  %v799_v43 = vadd.f32 %v1415_v32, %v792_v35  ;;  %v800_v37 = vadd.f32 %v1415_v32, %v793_v36  ;;  %v801_v44 = vadd.f32 %v1415_v32, %v794_v33  ;;  %v408_v33 = vpop.f32.mrf.mxu1 }
 0x252   :  { %v806_v45 = vmax.f32 %v802_v42, 0.0  ;;  %v803_v46 = vmax.f32 %v799_v43, 0.0  ;;  %v804_v48 = vmax.f32 %v800_v37, 0.0  ;;  %v805_v49 = vmax.f32 %v801_v44, 0.0 }
 0x253   :  { %v1080_v44 = vadd.f32 %v408_v33, %v1480_v1 }
 0x254   :  { %v839_v50 = vpack.c.bf16 %v803_v46, %v803_v46  ;;  %v840_v51 = vpack.c.bf16 %v804_v48, %v804_v48  ;;  %v807_v52 = vrot.slane %v803_v46, 7  ;;  %v808_v53 = vrot.slane %v804_v48, 7 }
 0x255   :  { %v810_v54 = vrot.slane %v806_v45, 7  ;;  %v823_v3 = vrot.slane %v803_v46, 1  ;;  %v824_v55 = vrot.slane %v804_v48, 1  ;;  %v825_v41 = vrot.slane %v805_v49, 1  ;;  %v1416_v46 = vld [vmem:[%s1906_s4] ss:$0 sm:$0xff] }
 0x256   :  { %v859_v56 = vunpack.c.l.b16 %v839_v50  ;;  %v860_v39 = vunpack.c.l.b16 %v840_v51  ;;  %v813_v40 = vsel %vm231_vm4, %v807_v52, %v808_v53  ;;  %v809_v7 = vrot.slane %v805_v49, 7 }
 0x257   :  { %v814_v57 = vsel %vm231_vm4, %v810_v54, %v807_v52  ;;  %v820_v58 = vpack.c.bf16 %v813_v40, %v813_v40  ;;  %v828_v59 = vsel %vm248_vm0, %v824_v55, %v825_v41  ;;  %v829_v60 = vsel %vm248_vm0, %v823_v3, %v824_v55 }
 0x258   :  { %v863_v61 = vpack.c.b16 %v860_v39, %v859_v56  ;;  %v815_v62 = vmul.f32 %v1607_v23, %v814_v57  ;;  %v832_v63 = vmul.f32 %v1543_v38, %v828_v59  ;;  %v835_v0 = vpack.c.bf16 %v829_v60, %v829_v60  ;;  %v410_v34 = vpop.f32.mrf.mxu1 }
 0x259   :  { %v826_v12 = vrot.slane %v806_v45, 1  ;;  %v848_v15 = vunpack.c.l.b16 %v820_v58  ;;  %v812_v20 = vsel %vm231_vm4, %v808_v53, %v809_v7  ;;  %v841_v38 = vpack.c.bf16 %v805_v49, %v805_v49 }
 0x25a   :  { %1050 = vmatmul.bf16.vlgmr.msrb.gmra.mxu2 %v863_v61  ;;  %v819_v4 = vpack.c.bf16 %v815_v62, %v815_v62  ;;  %v836_v5 = vpack.c.bf16 %v832_v63, %v832_v63  ;;  %v871_v16 = vunpack.c.l.b16 %v835_v0  ;;  %v842_v21 = vpack.c.bf16 %v806_v45, %v806_v45 }
 0x25b   :  { %v830_v23 = vsel %vm248_vm0, %v826_v12, %v823_v3  ;;  %v817_v22 = vmul.f32 %v1618_v2, %v812_v20  ;;  %v861_v11 = vunpack.c.l.b16 %v841_v38  ;;  %v811_v14 = vsel %vm231_vm4, %v809_v7, %v810_v54 }
 0x25c   :  { %v847_v13 = vunpack.c.l.b16 %v819_v4  ;;  %v872_v17 = vunpack.c.l.b16 %v836_v5  ;;  %v834_v24 = vmul.f32 %v1557_v47, %v830_v23  ;;  %v862_v25 = vunpack.c.l.b16 %v842_v21 }
 0x25d   :  { %v827_v26 = vsel %vm248_vm0, %v825_v41, %v826_v12  ;;  %v821_v9 = vpack.c.bf16 %v817_v22, %v817_v22  ;;  %v822_v8 = vpack.c.bf16 %v811_v14, %v811_v14 }
 0x25e   :  { %v851_v18 = vpack.c.b16 %v848_v15, %v847_v13  ;;  %v875_v19 = vpack.c.b16 %v872_v17, %v871_v16  ;;  %v838_v10 = vpack.c.bf16 %v834_v24, %v834_v24  ;;  %v864_v27 = vpack.c.b16 %v862_v25, %v861_v11 }
 0x25f   :  { %v837_v28 = vpack.c.bf16 %v827_v26, %v827_v26  ;;  %v849_v29 = vunpack.c.l.b16 %v821_v9  ;;  %v850_v31 = vunpack.c.l.b16 %v822_v8 }
 0x260   :  { %1031 = vmatmul.bf16.vlgmr.msrb.gmra.mxu1 %v851_v18  ;;  %1069 = vmatmul.bf16.vlgmr.msrb.gmra.mxu3 %v875_v19  ;;  %v874_v30 = vunpack.c.l.b16 %v838_v10  ;;  %v413_v35 = vpop.f32.mrf.mxu1 }
 0x261   :  { %v873_v2 = vunpack.c.l.b16 %v837_v28  ;;  %v852_v32 = vpack.c.b16 %v850_v31, %v849_v29 }
 0x263   :  { %v876_v47 = vpack.c.b16 %v874_v30, %v873_v2 }
 0x268   :  { %v415_v36 = vpop.f32.mrf.mxu1 }
 0x26a   :  { %1055 = vmatmul.bf16.gmra.mxu2 %v864_v27 }
 0x270   :  { %1036 = vmatmul.bf16.gmra.mxu1 %v852_v32  ;;  %1074 = vmatmul.bf16.gmra.mxu3 %v876_v47 }
 0x2dd   :  { %v1032_v6 = vpop.f32.mrf.mxu1  ;;  %v1051_v42 = vpop.f32.mrf.mxu2 }
 0x2de   :  { %v1052_v43 = vadd.f32 %v1051_v42, %v1032_v6 }
 0x2e3   :  { %v1070_v37 = vpop.f32.mrf.mxu3 }
 0x2e4   :  { %v1071_v45 = vadd.f32 %v1070_v37, %v1052_v43 }
 0x2e5   :  { %v1034_v48 = vpop.f32.mrf.mxu1  ;;  %v1053_v49 = vpop.f32.mrf.mxu2 }
 0x2e6   :  { %v1084_v50 = vadd.f32 %v1080_v44, %v1071_v45  ;;  %v1054_v52 = vadd.f32 %v1053_v49, %v1034_v48 }
 0x2e8   :  { %v1091_v51 = vadd.f32 %v1416_v46, %v1084_v50 }
 0x2ea   :  { %1095 = vst.msk [vmem:[%s1907_s9] sm:$0xff] %vm303_vm6, %v1091_v51 }
 0x2eb   :  { %v1072_v53 = vpop.f32.mrf.mxu3 }
 0x2ec   :  { %v1073_v3 = vadd.f32 %v1072_v53, %v1054_v52 }
 0x2ed   :  { %v1037_v55 = vpop.f32.mrf.mxu1  ;;  %v1056_v41 = vpop.f32.mrf.mxu2 }
 0x2ee   :  { %v1057_v40 = vadd.f32 %v1056_v41, %v1037_v55 }
 0x2f1   :  { %v1421_v1 = vld [vmem:[%s1898_s0 + $0x8] sm:$0xff] }
 0x2f2   :  { %v1081_v54 = vadd.f32 %v1421_v1, %v410_v34 }
 0x2f3   :  { %v1075_v57 = vpop.f32.mrf.mxu3 }
 0x2f4   :  { %v1085_v56 = vadd.f32 %v1081_v54, %v1073_v3  ;;  %v1076_v60 = vadd.f32 %v1075_v57, %v1057_v40 }
 0x2f5   :  { %v1039_v62 = vpop.f32.mrf.mxu1  ;;  %v1058_v63 = vpop.f32.mrf.mxu2 }
 0x2f6   :  { %v1092_v39 = vadd.f32 %v1416_v46, %v1085_v56  ;;  %v1059_v4 = vadd.f32 %v1058_v63, %v1039_v62 }
 0x2f8   :  { %1096 = vst.msk [vmem:[%s1907_s9 + $0x8] sm:$0xff] %vm303_vm6, %v1092_v39 }
 0x2fb   :  { %v1077_v5 = vpop.f32.mrf.mxu3 }
 0x2fc   :  { %v1078_v13 = vadd.f32 %v1077_v5, %v1059_v4 }
 0x2ff   :  { %v1422_v58 = vld [vmem:[%s1898_s0 + $0x10] sm:$0xff] }
 0x300   :  { %v1082_v59 = vadd.f32 %v1422_v58, %v413_v35 }
 0x302   :  { %v1086_v61 = vadd.f32 %v1082_v59, %v1076_v60 }
 0x304   :  { %v1093_v0 = vadd.f32 %v1416_v46, %v1086_v61 }
 0x306   :  { %1097 = vst.msk [vmem:[%s1907_s9 + $0x10] sm:$0xff] %vm303_vm6, %v1093_v0 }
 0x30d   :  { %v1423_v7 = vld [vmem:[%s1898_s0 + $0x18] sm:$0xff] }
 0x30e   :  { %v1083_v12 = vadd.f32 %v1423_v7, %v415_v36 }
 0x310   :  { %v1087_v15 = vadd.f32 %v1083_v12, %v1078_v13 }
 0x312   :  { %v1094_v16 = vadd.f32 %v1416_v46, %v1087_v15 }
 0x314   :  { %1098 = vst.msk [vmem:[%s1907_s9 + $0x18] sm:$0xff] %vm303_vm6, %v1094_v16 }

</bundles_post_ra>
